<compile_context>
chip_gen: v5e
topology: v5e:2x2
jax: 0.10.0
libtpu: 0.0.40
codegen_flags: <defaults>
</compile_context>

<pallas_src>
import functools
import math

import jax
import jax.numpy as jnp
from jax.experimental import pallas as pl
from jax.experimental.pallas import tpu as pltpu


def _round_up(v, m):
    return (v + m - 1) // m * m


def _logits_kernel(x_ref, w_ref, b_ref, o_ref, *, n_valid, tile_c):
    # x_ref : (64, F_pad)      bf16  spatial-major pooling input (resident)
    # w_ref : (F_pad, tile_c)  bf16  pre-transposed weight tile, 1/64 folded in
    # b_ref : (1, tile_c)      f32   bias tile (zero in padded lanes)
    # o_ref : (1, tile_c)      f32   masked logits tile
    i = pl.program_id(0)

    # Sum-pool over the 8*8 spatial axis (f32 accumulation); the 1/64 mean
    # scale is folded into the weight at init, so no extra multiply here.
    pooled = jnp.sum(x_ref[...].astype(jnp.float32), axis=0, keepdims=True)
    pooled = pooled.astype(jnp.bfloat16)

    # Canonical MXU contraction: (1, F_pad) x (F_pad, tile_c) -> (1, tile_c),
    # bf16 inputs with f32 accumulation, lane-dense output.
    logits = jax.lax.dot_general(
        pooled,
        w_ref[...],
        dimension_numbers=(((1,), (0,)), ((), ())),
        preferred_element_type=jnp.float32,
    ) + b_ref[...]

    # Padded class lanes must carry zero softmax mass.
    lane = jax.lax.broadcasted_iota(jnp.int32, logits.shape, 1) + i * tile_c
    o_ref[...] = jnp.where(lane < n_valid, logits, -1e30)


def _softmax_kernel(l_ref, o_ref):
    # Numerically stable softmax over a single (1, C_pad) row.  Exact division
    # so probabilities sum to 1 up to f32 rounding.
    logits = l_ref[...]
    m = jnp.max(logits, axis=-1, keepdims=True)
    e = jnp.exp(logits - m)
    o_ref[...] = e / jnp.sum(e, axis=-1, keepdims=True)


def prepare_inception_head_params(weight, bias):
    """One-time (model-init) parameter prep.

    weight: (n_classes, in_features) PyTorch Linear layout, f32.
    bias:   (n_classes,) f32.
    Returns (w_t_padded, b_padded): (F_pad, C_pad) bf16 with the 1/64 pool
    scale folded in, and (1, C_pad) f32.
    """
    n_classes, in_features = weight.shape
    f_pad = _round_up(in_features, 128)
    c_pad = _round_up(n_classes, 128)
    # Fold the 1/64 mean scale (exact power of two) into the weight, cast to
    # bf16, transpose to (F, C), zero-pad.  All done once, offline.
    w_t = jnp.pad(
        (weight * (1.0 / 64.0)).astype(jnp.bfloat16).T,
        ((0, f_pad - in_features), (0, c_pad - n_classes)),
    )
    b_padded = jnp.pad(bias.astype(jnp.float32),
                       (0, c_pad - n_classes)).reshape(1, c_pad)
    return w_t, b_padded


@functools.partial(jax.jit, static_argnames=("in_features", "n_classes"))
def modify_inceptionv3_forward(x, w_t_padded, b_padded, *, in_features, n_classes):
    """x: any array with in_features*64 elements (e.g. (1, F, 8, 8) NCHW).
    w_t_padded / b_padded: from prepare_inception_head_params (init-time)."""
    f_pad, c_pad = w_t_padded.shape
    tile_c = math.gcd(c_pad, 256)
    n_tiles = c_pad // tile_c

    # x is tiny (F*64 elements); the transpose/pad here is negligible next to
    # the classifier weight, which is passed in untouched.
    x2 = jnp.transpose(x.reshape(in_features, 8 * 8)).astype(jnp.bfloat16)
    x2 = jnp.pad(x2, ((0, 0), (0, f_pad - in_features)))

    logits_cost = pl.CostEstimate(
        flops=2 * f_pad * c_pad + n_tiles * 2 * 64 * f_pad,
        transcendentals=0,
        bytes_accessed=(64 * f_pad + f_pad * c_pad) * 2 + 2 * c_pad * 4,
    )
    logits = pl.pallas_call(
        functools.partial(_logits_kernel, n_valid=n_classes, tile_c=tile_c),
        out_shape=jax.ShapeDtypeStruct((1, c_pad), jnp.float32),
        grid=(n_tiles,),
        in_specs=[
            pl.BlockSpec((64, f_pad), lambda i: (0, 0)),       # resident
            pl.BlockSpec((f_pad, tile_c), lambda i: (0, i)),   # streamed
            pl.BlockSpec((1, tile_c), lambda i: (0, i)),
        ],
        out_specs=pl.BlockSpec((1, tile_c), lambda i: (0, i)),
        compiler_params=pltpu.CompilerParams(
            # Independent class tiles: lets v7x shard the weight stream across
            # both TensorCores; harmless on single-TC chips.
            dimension_semantics=("parallel",),
            vmem_limit_bytes=32 * 1024 * 1024,
        ),
        cost_estimate=logits_cost,
    )(x2, w_t_padded, b_padded)

    softmax_cost = pl.CostEstimate(
        flops=4 * c_pad,
        transcendentals=c_pad,
        bytes_accessed=2 * c_pad * 4,
    )
    probs = pl.pallas_call(
        _softmax_kernel,
        out_shape=jax.ShapeDtypeStruct((1, c_pad), jnp.float32),
        grid=(1,),
        in_specs=[pl.BlockSpec((1, c_pad), lambda i: (0, 0))],
        out_specs=pl.BlockSpec((1, c_pad), lambda i: (0, 0)),
        compiler_params=pltpu.CompilerParams(
            dimension_semantics=("arbitrary",)),
        cost_estimate=softmax_cost,
    )(logits)

    return probs[:, :n_classes]


if __name__ == "__main__":
    in_features = 160    # small, non-128-aligned stand-in for Inception's 2048
    n_classes = 10       # padded to 128 output lanes inside the wrapper
    key = jax.random.PRNGKey(0)
    kx, kw, kb = jax.random.split(key, 3)

    # Inception-v3 final feature map layout: NCHW with an 8x8 spatial map.
    x = jax.random.normal(kx, (1, in_features, 8, 8), dtype=jnp.float32)
    bound = 1.0 / jnp.sqrt(jnp.float32(in_features))
    weight = jax.random.uniform(kw, (n_classes, in_features),
                                minval=-bound, maxval=bound, dtype=jnp.float32)
    bias = jax.random.uniform(kb, (n_classes,),
                              minval=-bound, maxval=bound, dtype=jnp.float32)

    # One-time parameter prep (model init), then the per-call forward.
    w_t_padded, b_padded = prepare_inception_head_params(weight, bias)
    out = modify_inceptionv3_forward(x, w_t_padded, b_padded,
                                     in_features=in_features,
                                     n_classes=n_classes)
    out = jax.block_until_ready(out)
    assert out.shape == (1, n_classes)

    # Reference 1: same bf16 quantization of x / pooled / weight as the kernel
    # (the folded 1/64 is an exact power-of-two scale, so this matches).
    x_q = x.astype(jnp.bfloat16).astype(jnp.float32)
    w_q = weight.astype(jnp.bfloat16).astype(jnp.float32)
    pooled_q = x_q.reshape(in_features, 64).mean(axis=1)
    pooled_q = pooled_q.astype(jnp.bfloat16).astype(jnp.float32).reshape(1, -1)
    ref_q = jax.nn.softmax(pooled_q @ w_q.T + bias[None, :], axis=1)

    # Reference 2: full-f32 PyTorch semantics (bf16-level tolerance).
    pooled_f = x.reshape(in_features, 64).mean(axis=1).reshape(1, -1)
    ref_f = jax.nn.softmax(pooled_f @ weight.T + bias[None, :], axis=1)

    assert jnp.allclose(out, ref_q, atol=5e-3, rtol=2e-2), "mismatch vs bf16 reference"
    assert jnp.allclose(out, ref_f, atol=2e-2, rtol=5e-2), "mismatch vs f32 reference"
    assert jnp.allclose(jnp.sum(out, axis=1), 1.0, atol=1e-3)

    print("KERNEL_OK")
</pallas_src>

<mosaic_0001>
module attributes {stable_mosaic.version = 11 : i64} {
  func.func @_softmax_kernel(%arg0: i32, %arg1: memref<1x128xf32, #tpu.memory_space<vmem>>, %arg2: memref<1x128xf32, #tpu.memory_space<vmem>>) attributes {dimension_semantics = [#tpu.dimension_semantics<arbitrary>], iteration_bounds = array<i64: 1>, scalar_prefetch = 0 : i64, scratch_operands = 0 : i64, tpu.core_type = #tpu.core_type<tc>, window_params = [{pipeline_mode = #tpu.pipeline_mode<synchronous>, transform_indices = @transform_0, window_bounds = array<i64: 1, 128>}, {pipeline_mode = #tpu.pipeline_mode<synchronous>, transform_indices = @transform_1, window_bounds = array<i64: 1, 128>}]} {
    %c0 = arith.constant 0 : index
    %c0_0 = arith.constant 0 : index
    %0 = vector.load %arg1[%c0, %c0_0] : memref<1x128xf32, #tpu.memory_space<vmem>>, vector<1x128xf32>
    %cst = arith.constant dense<0xFF800000> : vector<1xf32>
    %1 = vector.multi_reduction <maximumf>, %0, %cst [1] : vector<1x128xf32> to vector<1xf32>
    %2 = vector.shape_cast %1 : vector<1xf32> to vector<1x1xf32>
    %3 = vector.broadcast %2 : vector<1x1xf32> to vector<1x128xf32>
    %4 = arith.subf %0, %3 : vector<1x128xf32>
    %5 = math.exp %4 : vector<1x128xf32>
    %cst_1 = arith.constant dense<0.000000e+00> : vector<1xf32>
    %6 = vector.multi_reduction <add>, %5, %cst_1 [1] : vector<1x128xf32> to vector<1xf32>
    %7 = vector.shape_cast %6 : vector<1xf32> to vector<1x1xf32>
    %8 = vector.broadcast %7 : vector<1x1xf32> to vector<1x128xf32>
    %9 = arith.divf %5, %8 : vector<1x128xf32>
    %c0_2 = arith.constant 0 : index
    %c0_3 = arith.constant 0 : index
    %10 = vector.load %arg2[%c0_2, %c0_3] : memref<1x128xf32, #tpu.memory_space<vmem>>, vector<1x128xf32>
    tpu.vector_store %arg2[%c0_2, %c0_3], %9 {strides = array<i32>} : memref<1x128xf32, #tpu.memory_space<vmem>>, vector<1x128xf32>,
    return
  }
  func.func @transform_0(%arg0: i32) -> (i32, i32) {
    %c0_i32 = arith.constant 0 : i32
    %c0_i32_0 = arith.constant 0 : i32
    %c0_i32_1 = arith.constant 0 : i32
    return %c0_i32, %c0_i32_0 : i32, i32
  }
  func.func @transform_1(%arg0: i32) -> (i32, i32) {
    %c0_i32 = arith.constant 0 : i32
    %c0_i32_0 = arith.constant 0 : i32
    %c0_i32_1 = arith.constant 0 : i32
    return %c0_i32, %c0_i32_0 : i32, i32
  }
}

module attributes {stable_mosaic.version = 11 : i64} {
  func.func @_logits_kernel(%arg0: i32, %arg1: memref<64x256xbf16, #tpu.memory_space<vmem>>, %arg2: memref<256x128xbf16, #tpu.memory_space<vmem>>, %arg3: memref<1x128xf32, #tpu.memory_space<vmem>>, %arg4: memref<1x128xf32, #tpu.memory_space<vmem>>) attributes {dimension_semantics = [#tpu.dimension_semantics<parallel>], iteration_bounds = array<i64: 1>, scalar_prefetch = 0 : i64, scratch_operands = 0 : i64, tpu.core_type = #tpu.core_type<tc>, window_params = [{pipeline_mode = #tpu.pipeline_mode<synchronous>, transform_indices = @transform_0, window_bounds = array<i64: 64, 256>}, {transform_indices = @transform_1, window_bounds = array<i64: 256, 128>}, {transform_indices = @transform_2, window_bounds = array<i64: 1, 128>}, {transform_indices = @transform_3, window_bounds = array<i64: 1, 128>}]} {
    %c0 = arith.constant 0 : index
    %c0_0 = arith.constant 0 : index
    %0 = vector.load %arg1[%c0, %c0_0] : memref<64x256xbf16, #tpu.memory_space<vmem>>, vector<64x256xbf16>
    %1 = arith.extf %0 : vector<64x256xbf16> to vector<64x256xf32>
    %cst = arith.constant dense<0.000000e+00> : vector<256xf32>
    %2 = vector.multi_reduction <add>, %1, %cst [0] : vector<64x256xf32> to vector<256xf32>
    %3 = vector.shape_cast %2 : vector<256xf32> to vector<1x256xf32>
    %4 = arith.truncf %3 : vector<1x256xf32> to vector<1x256xbf16>
    %c0_1 = arith.constant 0 : index
    %c0_2 = arith.constant 0 : index
    %5 = vector.load %arg2[%c0_1, %c0_2] : memref<256x128xbf16, #tpu.memory_space<vmem>>, vector<256x128xbf16>
    %cst_3 = arith.constant dense<0.000000e+00> : vector<1x128xf32>
    %6 = tpu.matmul %4, %5, %cst_3 {dimension_numbers = #tpu.dot_dimension_numbers<[1], [0], [0], [1], [0, 0, 1, 1], [], []>} : vector<1x256xbf16>, vector<256x128xbf16>, vector<1x128xf32> -> vector<1x128xf32>
    %c0_4 = arith.constant 0 : index
    %c0_5 = arith.constant 0 : index
    %7 = vector.load %arg3[%c0_4, %c0_5] : memref<1x128xf32, #tpu.memory_space<vmem>>, vector<1x128xf32>
    %8 = arith.addf %6, %7 : vector<1x128xf32>
    %9 = tpu.iota {dimensions = array<i32: 1>} : vector<1x128xi32>
    %c128_i32 = arith.constant 128 : i32
    %10 = arith.muli %arg0, %c128_i32 : i32
    %11 = vector.broadcast %10 : i32 to vector<1x128xi32>
    %12 = arith.addi %9, %11 : vector<1x128xi32>
    %c10_i32 = arith.constant 10 : i32
    %13 = vector.broadcast %c10_i32 : i32 to vector<1x128xi32>
    %14 = arith.cmpi slt, %12, %13 : vector<1x128xi32>
    %cst_6 = arith.constant -1.000000e+30 : f32
    %15 = vector.broadcast %cst_6 : f32 to vector<1x128xf32>
    %16 = arith.select %14, %8, %15 : vector<1x128xi1>, vector<1x128xf32>
    %c0_7 = arith.constant 0 : index
    %c0_8 = arith.constant 0 : index
    %17 = vector.load %arg4[%c0_7, %c0_8] : memref<1x128xf32, #tpu.memory_space<vmem>>, vector<1x128xf32>
    tpu.vector_store %arg4[%c0_7, %c0_8], %16 {strides = array<i32>} : memref<1x128xf32, #tpu.memory_space<vmem>>, vector<1x128xf32>,
    return
  }
  func.func @transform_0(%arg0: i32) -> (i32, i32) {
    %c0_i32 = arith.constant 0 : i32
    %c0_i32_0 = arith.constant 0 : i32
    %c0_i32_1 = arith.constant 0 : i32
    return %c0_i32, %c0_i32_0 : i32, i32
  }
  func.func @transform_1(%arg0: i32) -> (i32, i32) {
    %c0_i32 = arith.constant 0 : i32
    %c0_i32_0 = arith.constant 0 : i32
    return %c0_i32, %arg0 : i32, i32
  }
  func.func @transform_2(%arg0: i32) -> (i32, i32) {
    %c0_i32 = arith.constant 0 : i32
    %c0_i32_0 = arith.constant 0 : i32
    return %c0_i32, %arg0 : i32, i32
  }
  func.func @transform_3(%arg0: i32) -> (i32, i32) {
    %c0_i32 = arith.constant 0 : i32
    %c0_i32_0 = arith.constant 0 : i32
    return %c0_i32, %arg0 : i32, i32
  }
}

</mosaic_0001>

<bundles_post_ra>
// kernel: modify_inceptionv3_forward.3
= control target key start
LH: loop header
LB: loop body
LE: loop exit
PB: predicated region body
PF: predicated region fallthrough
CT: control target
= control target key end

     0   :  { %vm10_vm0 = vcmask 1040384   ;;  %s100_s0 = inlined_call_operand.vmem [shape: f32[1,128], index: 0, kind: input, shape index: {}]   ;;  %s101_s1 = inlined_call_operand.hbm [shape: f32[1,128], index: 1, kind: output, shape index: {}]  }
   0x1   :  { %v9_v0 = vld [vmem:[%s100_s0] sm:$0x1] }
   0x2   :  { %6 = vsyncpa [#allocation3], 0  ;;  %v11_v1 = vsel %vm10_vm0, %v9_v0, -inf  ;;  %s83_s0 = smov [#allocation2]   ;;  %s43_s11 = sshll.u32 %s101_s1, 4  ;;  %s44_s11 = int_to_ptr.hbm [resolvable:$true] %s43_s11 }
   0x3   :  { %12 = vmax.xlane.f32.xlu0 %v11_v1  ;;  %s41_s8 = sshll.u32 %s83_s0, 4  ;;  %s42_s8 = int_to_ptr.vmem [resolvable:$true] %s41_s8 }
  0x76   :  { %v13_v2 = vpop.xlane.xlu0 %12 }
  0x77   :  { %v14_v3 = vsub.f32 %v9_v0, %v13_v2 }
  0x79   :  { %v15_v4 = vmul.f32 1.442695, %v14_v3 }
  0x7b   :  { %53 = vpow2.f32 %v15_v4 }
  0x81   :  { %v54_v5 = vpop.eup %53 }
  0x82   :  { %v17_v6 = vsel %vm10_vm0, %v54_v5, 0.0 }
  0x83   :  { %18 = vadd.xlane.f32.xlu0 %v17_v6 }
  0xf6   :  { %v19_v7 = vpop.xlane.xlu0 %18 }
  0xf7   :  { %55 = vrcp.f32 %v19_v7  ;;  %v31_v11 = vand.u32 2147483648, %v19_v7  ;;  %v29_v13 = vand.u32 2147483647, %v19_v7  ;;  %vm25_vm2 = vweird.f32 %v19_v7 }
  0xf9   :  { %v32_v15 = vor.u32 1.1754944e-38, %v31_v11  ;;  %vm30_vm4 = vcmp.eq.f32.partialorder %v29_v13, 8.507059e+37 }
  0xfd   :  { %v56_v8 = vpop.eup %55 }
  0xfe   :  { %v21_v9 = vmul.f32 %v56_v8, %v19_v7  ;;  %vm26_vm1 = vweird.f32 %v56_v8 }
  0xff   :  { %vm27_vm3 = vmor %vm25_vm2, %vm26_vm1 }
 0x100   :  { %v22_v10 = vsub.f32 1.0, %v21_v9 }
 0x102   :  { %v23_v12 = vmul.f32 %v56_v8, %v22_v10 }
 0x104   :  { %v24_v14 = vadd.f32 %v56_v8, %v23_v12 }
 0x106   :  { %v28_v16 = vsel %vm27_vm3, %v56_v8, %v24_v14 }
 0x107   :  { %v33_v17 = vsel %vm30_vm4, %v32_v15, %v28_v16 }
 0x108   :  { %v34_v18 = vmul.f32 %v54_v5, %v33_v17 }
 0x10a   :  { %35 = vst [vmem:[#allocation2] sm:$0x1] %v34_v18 }
 0x10b   :  { %46 = dma.vmem_to_hbm [thread:$0]  %s42_s8, 16, %s44_s11, [#allocation3]  }
 0x10c   :  { %81 = dma.done.wait [#allocation3], 16  }
 0x10d   :  { %82 = vsyncadd [#allocation3], 4294967280 }
 0x10e   :  { %51 = vsyncpa [#allocation3], 1 }

// kernel: modify_inceptionv3_forward.2
= control target key start
LH: loop header
LB: loop body
LE: loop exit
PB: predicated region body
PF: predicated region fallthrough
CT: control target
= control target key end

     0   :  { %s411_s1 = inlined_call_operand.vmem [shape: bf16[256,128], index: 1, kind: input, shape index: {}]   ;;  %s412_s0 = inlined_call_operand.vmem [shape: bf16[64,256], index: 0, kind: input, shape index: {}]   ;;  %s413_s2 = inlined_call_operand.vmem [shape: f32[1,128], index: 2, kind: input, shape index: {}]   ;;  %s414_s3 = inlined_call_operand.vmem [shape: f32[1,128], index: 3, kind: output, shape index: {}]  }
   0x1   :  { %v304_v0 = vld [vmem:[%s411_s1 + $0x38] sm:$0xff]  ;;  %v303_v2 = vld [vmem:[%s411_s1 + $0x30] sm:$0xff]  ;;  %v302_v4 = vld [vmem:[%s411_s1 + $0x28] sm:$0xff] }
   0x2   :  { %v312_v1 = vld [vmem:[%s411_s1 + $0x78] sm:$0xff]  ;;  %195 = vmatpush.bf16.msra.mxu0 %v304_v0  ;;  %v311_v3 = vld [vmem:[%s411_s1 + $0x70] sm:$0xff]  ;;  %v14_v5 = vld [vmem:[%s412_s0] sm:$0xff] }
   0x3   :  { %208 = vmatpush.bf16.msra.mxu1 %v312_v1  ;;  %v15_v6 = vld [vmem:[%s412_s0 + $0x8] sm:$0xff]  ;;  %v16_v8 = vld [vmem:[%s412_s0 + $0x10] sm:$0xff]  ;;  %v17_v9 = vld [vmem:[%s412_s0 + $0x18] sm:$0xff]  ;;  %v22_v10 = vunpack.c.l.bf16 %v14_v5  ;;  %v23_v12 = vunpack.c.h.bf16 %v14_v5 }
   0x4   :  { %v310_v7 = vld [vmem:[%s411_s1 + $0x68] sm:$0xff]  ;;  %v24_v11 = vunpack.c.l.bf16 %v15_v6  ;;  %v25_v13 = vunpack.c.h.bf16 %v15_v6  ;;  %v18_v14 = vld [vmem:[%s412_s0 + $0x20] sm:$0xff]  ;;  %v26_v15 = vunpack.c.l.bf16 %v16_v8  ;;  %v28_v16 = vunpack.c.l.bf16 %v17_v9  ;;  %v20_v26 = vld [vmem:[%s412_s0 + $0x30] sm:$0xff] }
   0x5   :  { %v27_v18 = vunpack.c.h.bf16 %v16_v8  ;;  %v19_v19 = vld [vmem:[%s412_s0 + $0x28] sm:$0xff]  ;;  %v301_v20 = vld [vmem:[%s411_s1 + $0x20] sm:$0xff]  ;;  %v30_v22 = vunpack.c.l.bf16 %v18_v14  ;;  %v29_v24 = vunpack.c.h.bf16 %v17_v9  ;;  %v31_v29 = vunpack.c.h.bf16 %v18_v14  ;;  %v21_v31 = vld [vmem:[%s412_s0 + $0x38] sm:$0xff] }
   0x6   :  { %196 = vmatpush.bf16.msra.mxu0 %v303_v2  ;;  %v38_v17 = vadd.f32 %v24_v11, %v22_v10  ;;  %v309_v21 = vld [vmem:[%s411_s1 + $0x60] sm:$0xff]  ;;  %v51_v25 = vadd.f32 %v25_v13, %v23_v12  ;;  %v32_v27 = vunpack.c.l.bf16 %v19_v19  ;;  %v300_v32 = vld [vmem:[%s411_s1 + $0x18] sm:$0xff]  ;;  %v34_v34 = vunpack.c.l.bf16 %v20_v26  ;;  %v299_v42 = vld [vmem:[%s411_s1 + $0x10] sm:$0xff] }
   0x7   :  { %209 = vmatpush.bf16.msra.mxu1 %v311_v3  ;;  %v308_v33 = vld [vmem:[%s411_s1 + $0x58] sm:$0xff]  ;;  %v33_v36 = vunpack.c.h.bf16 %v19_v19  ;;  %v36_v38 = vunpack.c.l.bf16 %v21_v31  ;;  %v35_v40 = vunpack.c.h.bf16 %v20_v26  ;;  %v307_v43 = vld [vmem:[%s411_s1 + $0x50] sm:$0xff]  ;;  %v37_v45 = vunpack.c.h.bf16 %v21_v31  ;;  %v298_v49 = vld [vmem:[%s411_s1 + $0x8] sm:$0xff] }
   0x8   :  { %v39_v23 = vadd.f32 %v38_v17, %v26_v15  ;;  %v52_v30 = vadd.f32 %v51_v25, %v27_v18  ;;  %v306_v50 = vld [vmem:[%s411_s1 + $0x48] sm:$0xff]  ;;  %v297_v55 = vld [vmem:[%s411_s1] sm:$0xff] }
   0x9   :  { %v305_v56 = vld [vmem:[%s411_s1 + $0x40] sm:$0xff] }
   0xa   :  { %197 = vmatpush.bf16.msra.mxu0 %v302_v4  ;;  %v40_v28 = vadd.f32 %v39_v23, %v28_v16  ;;  %v53_v37 = vadd.f32 %v52_v30, %v29_v24  ;;  %v221_v4 = vlaneseq  ;;  %v98_v5 = vld [vmem:[%s413_s2] sm:$0x1] }
   0xb   :  { %210 = vmatpush.bf16.msra.mxu1 %v310_v7 }
   0xc   :  { %v41_v35 = vadd.f32 %v40_v28, %v30_v22  ;;  %v54_v41 = vadd.f32 %v53_v37, %v31_v29  ;;  %v222_v6 = vand.u32 127, %v221_v4 }
   0xe   :  { %198 = vmatpush.bf16.msra.mxu0 %v301_v20  ;;  %v42_v39 = vadd.f32 %v41_v35, %v32_v27  ;;  %v55_v46 = vadd.f32 %v54_v41, %v33_v36  ;;  %vm226_vm0 = vcmp.lt.s32.totalorder %v222_v6, 10 }
   0xf   :  { %211 = vmatpush.bf16.msra.mxu1 %v309_v21 }
  0x10   :  { %v43_v44 = vadd.f32 %v42_v39, %v34_v34  ;;  %v56_v48 = vadd.f32 %v55_v46, %v35_v40 }
  0x12   :  { %199 = vmatpush.bf16.msra.mxu0 %v300_v32  ;;  %v44_v47 = vadd.f32 %v43_v44, %v36_v38  ;;  %v57_v52 = vadd.f32 %v56_v48, %v37_v45 }
  0x13   :  { %212 = vmatpush.bf16.msra.mxu1 %v308_v33 }
  0x14   :  { %v45_v51 = vrot.slane %v44_v47, 4  ;;  %v58_v54 = vrot.slane %v57_v52, 4 }
  0x16   :  { %200 = vmatpush.bf16.msra.mxu0 %v299_v42  ;;  %v46_v53 = vadd.f32 %v45_v51, %v44_v47  ;;  %v59_v58 = vadd.f32 %v58_v54, %v57_v52 }
  0x17   :  { %213 = vmatpush.bf16.msra.mxu1 %v307_v43 }
  0x18   :  { %v47_v57 = vrot.slane %v46_v53, 2  ;;  %v60_v60 = vrot.slane %v59_v58, 2 }
  0x1a   :  { %201 = vmatpush.bf16.msra.mxu0 %v298_v49  ;;  %v48_v59 = vadd.f32 %v47_v57, %v46_v53  ;;  %v61_v62 = vadd.f32 %v60_v60, %v59_v58 }
  0x1b   :  { %214 = vmatpush.bf16.msra.mxu1 %v306_v50 }
  0x1c   :  { %v49_v61 = vrot.slane %v48_v59, 1  ;;  %v62_v0 = vrot.slane %v61_v62, 1 }
  0x1e   :  { %202 = vmatpush.bf16.msra.mxu0 %v297_v55  ;;  %v50_v63 = vadd.f32 %v49_v61, %v48_v59  ;;  %v63_v2 = vadd.f32 %v62_v0, %v61_v62 }
  0x1f   :  { %215 = vmatpush.bf16.msra.mxu1 %v305_v56 }
  0x20   :  { %v64_v1 = vpack.c.bf16 %v50_v63, %v50_v63  ;;  %v65_v3 = vpack.c.bf16 %v63_v2, %v63_v2 }
  0x22   :  { %203 = vmatmul.bf16.vlgmr.msra.gmra.mxu0 %v64_v1  ;;  %216 = vmatmul.bf16.vlgmr.msra.gmra.mxu1 %v65_v3 }
  0x9f   :  { %v204_v7 = vpop.f32.mrf.mxu0  ;;  %v217_v9 = vpop.f32.mrf.mxu1 }
  0xa0   :  { %v205_v8 = vadd.f32 %v204_v7, %v98_v5 }
  0xa2   :  { %v218_v10 = vadd.f32 %v217_v9, %v205_v8 }
  0xa4   :  { %v227_v11 = vsel %vm226_vm0, %v218_v10, -1e+30 }
  0xa5   :  { %228 = vst [vmem:[%s414_s3] sm:$0x1] %v227_v11 }
  0xa7   :  { %v206_v12 = vpop.f32.mrf.mxu0  ;;  %v219_v13 = vpop.f32.mrf.mxu1 }

</bundles_post_ra>
